<compile_context>
chip_gen: v7x
topology: tpu7x:2x2x1
jax: 0.10.0
libtpu: 0.0.40
codegen_flags: <defaults>
</compile_context>

<pallas_src>
import jax
import jax.numpy as jnp
from jax import lax
from jax.experimental import pallas as pl
from jax.experimental.pallas import tpu as pltpu


_LANE = 128
_BN_EPS = 1e-5
_NORM_EPS_SQ = 1e-24   # clamping sum-of-squares at 1e-24 == clamping the norm at 1e-12


def _round_up(n, m):
    return pl.cdiv(n, m) * m


def _make_kernel(hid_p, out_p):
    def kernel(x_ref, w1_ref, vec_ref, w2_ref, o_ref):
        x = x_ref[...]                                            # (B, in_p) f32

        # ---- Linear 1 (MXU).  Bias b1 omitted: it cancels exactly in the
        # training-mode BatchNorm centering (h - mean). ----
        h = jnp.dot(x, w1_ref[...],
                    preferred_element_type=jnp.float32)           # (B, hid_p)

        # ---- BatchNorm1d, training-mode batch statistics.
        # Two-pass centered variance (no E[h^2]-mean^2 cancellation). ----
        mean = jnp.mean(h, axis=0, keepdims=True)                 # (1, hid_p)
        c = h - mean
        var = jnp.mean(c * c, axis=0, keepdims=True)              # biased variance
        gamma = vec_ref[0:1, :hid_p]
        beta = vec_ref[1:2, :hid_p]
        h = c * (gamma * lax.rsqrt(var + _BN_EPS)) + beta

        # ---- ReLU ----
        h = jnp.maximum(h, 0.0)

        # ---- Linear 2 (MXU) ----
        b2 = vec_ref[2:3, :out_p]
        y = jnp.dot(h, w2_ref[...],
                    preferred_element_type=jnp.float32) + b2      # (B, out_p)

        # ---- F.normalize(dim=1), p=2, eps=1e-12.  Padded output columns are
        # exact zeros so they contribute nothing to the row sum-of-squares. ----
        sumsq = jnp.sum(y * y, axis=1, keepdims=True)             # (B, 1)
        z = y * lax.rsqrt(jnp.maximum(sumsq, _NORM_EPS_SQ))
        o_ref[...] = z.astype(o_ref.dtype)

    return kernel


def classifier_forward(x, w1, b1, gamma, beta, w2, b2):
    """Forward pass of `Classifier`.

    `b1` is accepted for interface parity with nn.Linear but is algebraically
    dead under training-mode BatchNorm (it cancels in `h - mean`), so it is
    never sent to the kernel.
    """
    del b1
    B, in_fea = x.shape
    hid_fea = w1.shape[1]
    out_fea = w2.shape[1]

    in_p = _round_up(in_fea, _LANE)
    hid_p = _round_up(hid_fea, _LANE)
    out_p = _round_up(out_fea, _LANE)
    vec_w = max(hid_p, out_p)

    f32 = jnp.float32
    # Lane-pad everything to 128-wide tiles (exact zero padding -> identical math).
    x_p = jnp.zeros((B, in_p), f32).at[:, :in_fea].set(x.astype(f32))
    w1_p = jnp.zeros((in_p, hid_p), f32).at[:in_fea, :hid_fea].set(w1.astype(f32))
    w2_p = jnp.zeros((hid_p, out_p), f32).at[:hid_fea, :out_fea].set(w2.astype(f32))
    # Single (3, 128) slab for the remaining per-feature vectors -> one DMA.
    vec = jnp.zeros((3, vec_w), f32)
    vec = vec.at[0, :hid_fea].set(gamma.astype(f32))
    vec = vec.at[1, :hid_fea].set(beta.astype(f32))
    vec = vec.at[2, :out_fea].set(b2.astype(f32))

    vmem = pl.BlockSpec(memory_space=pltpu.MemorySpace.VMEM)

    flops = 2 * B * in_p * hid_p + 2 * B * hid_p * out_p
    bytes_accessed = 4 * (B * in_p + in_p * hid_p + 3 * vec_w
                          + hid_p * out_p + B * out_p)

    z_pad = pl.pallas_call(
        _make_kernel(hid_p, out_p),
        out_shape=jax.ShapeDtypeStruct((B, out_p), x.dtype),
        in_specs=[vmem] * 4,
        out_specs=vmem,
        cost_estimate=pl.CostEstimate(
            flops=flops,
            transcendentals=hid_p + B,
            bytes_accessed=bytes_accessed,
        ),
    )(x_p, w1_p, vec, w2_p)

    return z_pad[:, :out_fea]


def _reference(x, w1, b1, gamma, beta, w2, b2):
    h = x @ w1 + b1
    mean = h.mean(axis=0, keepdims=True)
    var = ((h - mean) ** 2).mean(axis=0, keepdims=True)
    h = (h - mean) / jnp.sqrt(var + 1e-5) * gamma + beta
    h = jnp.maximum(h, 0.0)
    y = h @ w2 + b2
    n = jnp.sqrt(jnp.sum(y * y, axis=1, keepdims=True))
    return y / jnp.maximum(n, 1e-12)


if __name__ == "__main__":
    # Small shapes consistent with the module's forward: doc_fea is (B, in_fea).
    B, in_fea, hid_fea, out_fea = 8, 32, 64, 16

    key = jax.random.PRNGKey(0)
    kx, kw1, kb1, kw2, kb2 = jax.random.split(key, 5)

    x = jax.random.normal(kx, (B, in_fea), dtype=jnp.float32)

    # Deterministic parameter init (nn.Linear-style uniform bounds).
    lim1 = 1.0 / (in_fea ** 0.5)
    w1 = jax.random.uniform(kw1, (in_fea, hid_fea), jnp.float32, -lim1, lim1)
    b1 = jax.random.uniform(kb1, (hid_fea,), jnp.float32, -lim1, lim1)
    gamma = jnp.ones((hid_fea,), jnp.float32)   # BatchNorm1d weight
    beta = jnp.zeros((hid_fea,), jnp.float32)   # BatchNorm1d bias
    lim2 = 1.0 / (hid_fea ** 0.5)
    w2 = jax.random.uniform(kw2, (hid_fea, out_fea), jnp.float32, -lim2, lim2)
    b2 = jax.random.uniform(kb2, (out_fea,), jnp.float32, -lim2, lim2)

    z = classifier_forward(x, w1, b1, gamma, beta, w2, b2)
    z = jax.block_until_ready(z)

    z_ref = _reference(x, w1, b1, gamma, beta, w2, b2)
    assert z.shape == (B, out_fea)
    assert jnp.allclose(z, z_ref, atol=1e-5, rtol=1e-5)

    print("KERNEL_OK")
</pallas_src>

<mosaic_0001>
module attributes {stable_mosaic.version = 11 : i64} {
  func.func @kernel(%arg0: memref<8x128xf32, #tpu.memory_space<vmem>>, %arg1: memref<128x128xf32, #tpu.memory_space<vmem>>, %arg2: memref<3x128xf32, #tpu.memory_space<vmem>>, %arg3: memref<128x128xf32, #tpu.memory_space<vmem>>, %arg4: memref<8x128xf32, #tpu.memory_space<vmem>>) attributes {dimension_semantics = [], scalar_prefetch = 0 : i64, scratch_operands = 0 : i64, tpu.core_type = #tpu.core_type<tc>} {
    %c0 = arith.constant 0 : index
    %c0_0 = arith.constant 0 : index
    %0 = vector.load %arg0[%c0, %c0_0] : memref<8x128xf32, #tpu.memory_space<vmem>>, vector<8x128xf32>
    %c0_1 = arith.constant 0 : index
    %c0_2 = arith.constant 0 : index
    %1 = vector.load %arg1[%c0_1, %c0_2] : memref<128x128xf32, #tpu.memory_space<vmem>>, vector<128x128xf32>
    %cst = arith.constant dense<0.000000e+00> : vector<8x128xf32>
    %2 = tpu.matmul %0, %1, %cst {dimension_numbers = #tpu.dot_dimension_numbers<[1], [0], [0], [1], [0, 0, 1, 1], [], []>} : vector<8x128xf32>, vector<128x128xf32>, vector<8x128xf32> -> vector<8x128xf32>
    %cst_3 = arith.constant dense<0.000000e+00> : vector<128xf32>
    %3 = vector.multi_reduction <add>, %2, %cst_3 [0] : vector<8x128xf32> to vector<128xf32>
    %4 = vector.shape_cast %3 : vector<128xf32> to vector<1x128xf32>
    %cst_4 = arith.constant 8.000000e+00 : f32
    %5 = vector.broadcast %cst_4 : f32 to vector<1x128xf32>
    %6 = arith.divf %4, %5 : vector<1x128xf32>
    %7 = vector.broadcast %6 : vector<1x128xf32> to vector<8x128xf32>
    %8 = arith.subf %2, %7 : vector<8x128xf32>
    %9 = arith.mulf %8, %8 : vector<8x128xf32>
    %cst_5 = arith.constant dense<0.000000e+00> : vector<128xf32>
    %10 = vector.multi_reduction <add>, %9, %cst_5 [0] : vector<8x128xf32> to vector<128xf32>
    %11 = vector.shape_cast %10 : vector<128xf32> to vector<1x128xf32>
    %cst_6 = arith.constant 8.000000e+00 : f32
    %12 = vector.broadcast %cst_6 : f32 to vector<1x128xf32>
    %13 = arith.divf %11, %12 : vector<1x128xf32>
    %c0_7 = arith.constant 0 : index
    %c0_8 = arith.constant 0 : index
    %14 = vector.load %arg2[%c0_7, %c0_8] : memref<3x128xf32, #tpu.memory_space<vmem>>, vector<1x128xf32>
    %c1 = arith.constant 1 : index
    %c0_9 = arith.constant 0 : index
    %15 = vector.load %arg2[%c1, %c0_9] : memref<3x128xf32, #tpu.memory_space<vmem>>, vector<1x128xf32>
    %cst_10 = arith.constant 9.99999974E-6 : f32
    %16 = vector.broadcast %cst_10 : f32 to vector<1x128xf32>
    %17 = arith.addf %13, %16 : vector<1x128xf32>
    %18 = math.rsqrt %17 : vector<1x128xf32>
    %19 = arith.mulf %14, %18 : vector<1x128xf32>
    %20 = vector.broadcast %19 : vector<1x128xf32> to vector<8x128xf32>
    %21 = arith.mulf %8, %20 : vector<8x128xf32>
    %22 = vector.broadcast %15 : vector<1x128xf32> to vector<8x128xf32>
    %23 = arith.addf %21, %22 : vector<8x128xf32>
    %cst_11 = arith.constant 0.000000e+00 : f32
    %24 = vector.broadcast %cst_11 : f32 to vector<8x128xf32>
    %25 = arith.maximumf %23, %24 : vector<8x128xf32>
    %c2 = arith.constant 2 : index
    %c0_12 = arith.constant 0 : index
    %26 = vector.load %arg2[%c2, %c0_12] : memref<3x128xf32, #tpu.memory_space<vmem>>, vector<1x128xf32>
    %c0_13 = arith.constant 0 : index
    %c0_14 = arith.constant 0 : index
    %27 = vector.load %arg3[%c0_13, %c0_14] : memref<128x128xf32, #tpu.memory_space<vmem>>, vector<128x128xf32>
    %cst_15 = arith.constant dense<0.000000e+00> : vector<8x128xf32>
    %28 = tpu.matmul %25, %27, %cst_15 {dimension_numbers = #tpu.dot_dimension_numbers<[1], [0], [0], [1], [0, 0, 1, 1], [], []>} : vector<8x128xf32>, vector<128x128xf32>, vector<8x128xf32> -> vector<8x128xf32>
    %29 = vector.broadcast %26 : vector<1x128xf32> to vector<8x128xf32>
    %30 = arith.addf %28, %29 : vector<8x128xf32>
    %31 = arith.mulf %30, %30 : vector<8x128xf32>
    %cst_16 = arith.constant dense<0.000000e+00> : vector<8xf32>
    %32 = vector.multi_reduction <add>, %31, %cst_16 [1] : vector<8x128xf32> to vector<8xf32>
    %33 = vector.shape_cast %32 : vector<8xf32> to vector<8x1xf32>
    %cst_17 = arith.constant 1.000000e-24 : f32
    %34 = vector.broadcast %cst_17 : f32 to vector<8x1xf32>
    %35 = arith.maximumf %33, %34 : vector<8x1xf32>
    %36 = math.rsqrt %35 : vector<8x1xf32>
    %37 = vector.broadcast %36 : vector<8x1xf32> to vector<8x128xf32>
    %38 = arith.mulf %30, %37 : vector<8x128xf32>
    %c0_18 = arith.constant 0 : index
    %c0_19 = arith.constant 0 : index
    %39 = vector.load %arg4[%c0_18, %c0_19] : memref<8x128xf32, #tpu.memory_space<vmem>>, vector<8x128xf32>
    tpu.vector_store %arg4[%c0_18, %c0_19], %38 {strides = array<i32>} : memref<8x128xf32, #tpu.memory_space<vmem>>, vector<8x128xf32>,
    return
  }
}

</mosaic_0001>

<bundles_post_ra>
// kernel: tpu_custom_call.1
= control target key start
LH: loop header
LB: loop body
LE: loop exit
PB: predicated region body
PF: predicated region fallthrough
CT: control target
= control target key end

     0   :  { %9 = vsyncpa [#allocation3], 0  ;;  %s665_s0 = inlined_call_operand.hbm [shape: f32[8,128], index: 0, kind: input, shape index: {}]   ;;  %s666_s1 = inlined_call_operand.hbm [shape: f32[128,128], index: 1, kind: input, shape index: {}]   ;;  %s667_s2 = inlined_call_operand.vmem [shape: f32[3,128], index: 2, kind: input, shape index: {}]   ;;  %s668_s3 = inlined_call_operand.hbm [shape: f32[128,128], index: 3, kind: input, shape index: {}]   ;;  %s669_s4 = inlined_call_operand.hbm [shape: f32[8,128], index: 4, kind: output, shape index: {}]  }
   0x1   :  { %10 = vsyncpa [#allocation6], 0 }
   0x2   :  { %11 = vsyncpa [#allocation4], 0  ;;  %s552_s15 = smov [#allocation5]   ;;  %s458_s19 = scalar_lea.hbm %s666_s1, 2048 }
   0x3   :  { %s27_s16 = sshll.u32 %s552_s15, 4  ;;  %p459_p0 = scmp.ne.s32.totalorder %s666_s1, %s458_s19  ;;  %s28_s16 = int_to_ptr.vmem [resolvable:$true] %s27_s16 }
   0x4   :  { %p462_p1 = scmp.lt.u32.totalorder %s458_s19, %s666_s1 }
   0x6   :  { %p464_p2 = pnand %p462_p1, %p459_p0 }
   0x8   :  { %467 = shalt.err (!%p464_p2)
}
   0x9   :  { %s468_s24 = scalar_lea.vmem %s28_s16, 2048  ;;  %p473_p4 = scmp.lt.s32.totalorder %s28_s16, %s28_s16 }
   0xa   :  { %p469_p3 = scmp.ne.s32.totalorder %s28_s16, %s468_s24  ;;  %p474_p5 = scmp.lt.s32.totalorder %s468_s24, %s468_s24 }
   0xc   :  { %p475_p6 = por %p474_p5, %p473_p4 }
   0xe   :  { %p476_p7 = pnand %p475_p6, %p469_p3 }
  0x10   :  { %479 = shalt.err (!%p476_p7)
}
  0x11   :  { %s553_s25 = smov 128   ;;  %s554_s26 = smov 8  }
  0x12   :  { %33 = dma.hbm_to_vmem [thread:$0]  %s666_s1, 2048, %s28_s16, [#allocation6], %s553_s25, %s553_s25, %s554_s26  }
  0x13   :  { %s555_s29 = smov [#allocation2]   ;;  %s556_s5 = smov [#allocation7]  }
  0x14   :  { %s18_s30 = sshll.u32 %s555_s29, 4  ;;  %s41_s6 = sshll.u32 %s556_s5, 4  ;;  %s19_s30 = int_to_ptr.vmem [resolvable:$true] %s18_s30  ;;  %s42_s6 = int_to_ptr.vmem [resolvable:$true] %s41_s6 }
  0x15   :  { %s480_s9 = scalar_lea.hbm %s665_s0, 128 }
  0x16   :  { %p481_p8 = scmp.ne.s32.totalorder %s665_s0, %s480_s9  ;;  %p484_p9 = scmp.lt.u32.totalorder %s480_s9, %s665_s0 }
  0x18   :  { %p486_p10 = pnand %p484_p9, %p481_p8 }
  0x1a   :  { %489 = shalt.err (!%p486_p10)
}
  0x1b   :  { %s490_s1 = scalar_lea.vmem %s19_s30, 128  ;;  %p495_p12 = scmp.lt.s32.totalorder %s19_s30, %s19_s30 }
  0x1c   :  { %p491_p11 = scmp.ne.s32.totalorder %s19_s30, %s490_s1  ;;  %p496_p13 = scmp.lt.s32.totalorder %s490_s1, %s490_s1 }
  0x1e   :  { %p497_p0 = por %p496_p13, %p495_p12 }
  0x20   :  { %p498_p1 = pnand %p497_p0, %p491_p11 }
  0x22   :  { %501 = shalt.err (!%p498_p1)
}
  0x23   :  { %21 = dma.hbm_to_vmem [thread:$0]  %s665_s0, 128, %s19_s30, [#allocation3]  }
  0x24   :  { %s502_s18 = scalar_lea.hbm %s668_s3, 2048 }
  0x25   :  { %p503_p2 = scmp.ne.s32.totalorder %s668_s3, %s502_s18  ;;  %p506_p3 = scmp.lt.u32.totalorder %s502_s18, %s668_s3 }
  0x27   :  { %p508_p4 = pnand %p506_p3, %p503_p2 }
  0x29   :  { %511 = shalt.err (!%p508_p4)
}
  0x2a   :  { %s512_s23 = scalar_lea.vmem %s42_s6, 2048  ;;  %p517_p6 = scmp.lt.s32.totalorder %s42_s6, %s42_s6 }
  0x2b   :  { %p513_p5 = scmp.ne.s32.totalorder %s42_s6, %s512_s23  ;;  %p518_p7 = scmp.lt.s32.totalorder %s512_s23, %s512_s23 }
  0x2d   :  { %p519_p8 = por %p518_p7, %p517_p6 }
  0x2f   :  { %p520_p9 = pnand %p519_p8, %p513_p5 }
  0x31   :  { %523 = shalt.err (!%p520_p9)
}
  0x32   :  { %47 = dma.hbm_to_vmem [thread:$0]  %s668_s3, 2048, %s42_s6, [#allocation6], %s553_s25, %s553_s25, %s554_s26  }
  0x33   :  { %546 = dma.done.wait [#allocation3], 128  }
  0x34   :  { %547 = vsyncadd [#allocation3], 4294967168 }
  0x35   :  { %548 = dma.done.wait [#allocation6], 4096  }
  0x36   :  { %549 = vsyncadd [#allocation6], 4294963200  ;;  %v557_v0 = vmov 0.0|0.0   ;;  %vm558_vm0 = vmmov 0   ;;  %v559_v1 = vmov 0.0   ;;  %v58_v2 = vld [vmem:[#allocation5] sm:$0xff] }
  0x37   :  { %397 = vmatprep.subr.bf16.mxu0 %v557_v0  ;;  %359 = vmatprep.mubr.msk.f32.mxu0 %vm558_vm0, %v559_v1  ;;  %v59_v3 = vld [vmem:[#allocation5 + $0x8] sm:$0xff]  ;;  %v60_v4 = vld [vmem:[#allocation5 + $0x10] sm:$0xff]  ;;  %v61_v6 = vld [vmem:[#allocation5 + $0x18] sm:$0xff]  ;;  %s560_s30 = smov [#allocation8]  }
  0x38   :  { %421 = vmatprep.subr.bf16.mxu1 %v557_v0  ;;  %394 = vmatprep.mubr.msk.f32.mxu1 %vm558_vm0, %v559_v1  ;;  %v398_v5 = vpack.c.bf16 %v59_v3, %v58_v2  ;;  %v401_v7 = vpack.c.bf16 %v61_v6, %v60_v4  ;;  %v62_v8 = vld [vmem:[#allocation5 + $0x20] sm:$0xff]  ;;  %v63_v9 = vld [vmem:[#allocation5 + $0x28] sm:$0xff]  ;;  %v64_v11 = vld [vmem:[#allocation5 + $0x30] sm:$0xff]  ;;  %v166_v6 = vlaneseq  ;;  %s281_s5 = sshll.u32 %s560_s30, 4  ;;  %s282_s5 = int_to_ptr.vmem [resolvable:$true] %s281_s5 }
  0x39   :  { %v404_v10 = vpack.c.bf16 %v63_v9, %v62_v8  ;;  %v65_v12 = vld [vmem:[#allocation5 + $0x38] sm:$0xff]  ;;  %v66_v14 = vld [vmem:[#allocation5 + $0x40] sm:$0xff]  ;;  %v67_v15 = vld [vmem:[#allocation5 + $0x48] sm:$0xff]  ;;  %s524_s6 = scalar_lea.vmem %s282_s5, 128  ;;  %p529_p11 = scmp.lt.s32.totalorder %s282_s5, %s282_s5 }
  0x3a   :  { %399 = vmatpush3.bf16.msra.mxu0 %v398_v5  ;;  %v407_v13 = vpack.c.bf16 %v65_v12, %v64_v11  ;;  %v410_v16 = vpack.c.bf16 %v67_v15, %v66_v14  ;;  %v68_v17 = vld [vmem:[#allocation5 + $0x50] sm:$0xff]  ;;  %v69_v18 = vld [vmem:[#allocation5 + $0x58] sm:$0xff]  ;;  %v70_v20 = vld [vmem:[#allocation5 + $0x60] sm:$0xff]  ;;  %p525_p10 = scmp.ne.s32.totalorder %s282_s5, %s524_s6  ;;  %p530_p12 = scmp.lt.s32.totalorder %s524_s6, %s524_s6 }
  0x3b   :  { %400 = vmatprep.subr.bf16.mxu0 %v557_v0  ;;  %v413_v19 = vpack.c.bf16 %v69_v18, %v68_v17  ;;  %v71_v21 = vld [vmem:[#allocation5 + $0x68] sm:$0xff]  ;;  %v72_v23 = vld [vmem:[#allocation5 + $0x70] sm:$0xff]  ;;  %v73_v24 = vld [vmem:[#allocation5 + $0x78] sm:$0xff] }
  0x3c   :  { %v416_v22 = vpack.c.bf16 %v71_v21, %v70_v20  ;;  %v419_v25 = vpack.c.bf16 %v73_v24, %v72_v23  ;;  %v57_v26 = vld [vmem:[#allocation2] sm:$0xff]  ;;  %v178_v27 = vld [vmem:[#allocation7] sm:$0xff]  ;;  %v179_v28 = vld [vmem:[#allocation7 + $0x8] sm:$0xff]  ;;  %p531_p13 = por %p530_p12, %p529_p11 }
  0x3d   :  { %v422_v29 = vpack.c.bf16 %v179_v28, %v178_v27  ;;  %v180_v30 = vld [vmem:[#allocation7 + $0x10] sm:$0xff]  ;;  %v181_v31 = vld [vmem:[#allocation7 + $0x18] sm:$0xff]  ;;  %v182_v33 = vld [vmem:[#allocation7 + $0x20] sm:$0xff] }
  0x3e   :  { %402 = vmatpush3.bf16.msra.mxu0 %v401_v7  ;;  %v425_v32 = vpack.c.bf16 %v181_v31, %v180_v30  ;;  %v183_v34 = vld [vmem:[#allocation7 + $0x28] sm:$0xff]  ;;  %v184_v36 = vld [vmem:[#allocation7 + $0x30] sm:$0xff]  ;;  %v185_v37 = vld [vmem:[#allocation7 + $0x38] sm:$0xff]  ;;  %v167_v7 = vshrl.u32 %v166_v6, 7  ;;  %p532_p0 = pnand %p531_p13, %p525_p10 }
  0x3f   :  { %403 = vmatprep.subr.bf16.mxu0 %v557_v0  ;;  %423 = vmatpush3.bf16.msra.mxu1 %v422_v29  ;;  %v428_v35 = vpack.c.bf16 %v183_v34, %v182_v33  ;;  %v431_v38 = vpack.c.bf16 %v185_v37, %v184_v36  ;;  %v186_v39 = vld [vmem:[#allocation7 + $0x40] sm:$0xff]  ;;  %v187_v40 = vld [vmem:[#allocation7 + $0x48] sm:$0xff]  ;;  %v188_v42 = vld [vmem:[#allocation7 + $0x50] sm:$0xff] }
  0x40   :  { %424 = vmatprep.subr.bf16.mxu1 %v557_v0  ;;  %v434_v41 = vpack.c.bf16 %v187_v40, %v186_v39  ;;  %v189_v43 = vld [vmem:[#allocation7 + $0x58] sm:$0xff]  ;;  %v190_v45 = vld [vmem:[#allocation7 + $0x60] sm:$0xff]  ;;  %v191_v46 = vld [vmem:[#allocation7 + $0x68] sm:$0xff]  ;;  %v168_v9 = vsub.s32 0, %v167_v7 }
  0x41   :  { %v437_v44 = vpack.c.bf16 %v189_v43, %v188_v42  ;;  %v440_v47 = vpack.c.bf16 %v191_v46, %v190_v45  ;;  %v192_v48 = vld [vmem:[#allocation7 + $0x70] sm:$0xff]  ;;  %v193_v49 = vld [vmem:[#allocation7 + $0x78] sm:$0xff] }
  0x42   :  { %405 = vmatpush3.bf16.msra.mxu0 %v404_v10  ;;  %v443_v50 = vpack.c.bf16 %v193_v49, %v192_v48  ;;  %v161_v8 = vld [vmem:[%s667_s2] sm:$0x1]  ;;  %v292_v17 = vld [vmem:[%s667_s2 + $0x2] ss:$0 sm:$0xff] }
  0x43   :  { %406 = vmatprep.subr.bf16.mxu0 %v557_v0  ;;  %426 = vmatpush3.bf16.msra.mxu1 %v425_v32 }
  0x44   :  { %427 = vmatprep.subr.bf16.mxu1 %v557_v0 }
  0x46   :  { %408 = vmatpush3.bf16.msra.mxu0 %v407_v13  ;;  %v291_v13 = vld [vmem:[%s667_s2 + $0x1] ss:$0 sm:$0xff] }
  0x47   :  { %409 = vmatprep.subr.bf16.mxu0 %v557_v0  ;;  %429 = vmatpush3.bf16.msra.mxu1 %v428_v35 }
  0x48   :  { %430 = vmatprep.subr.bf16.mxu1 %v557_v0 }
  0x4a   :  { %411 = vmatpush3.bf16.msra.mxu0 %v410_v16 }
  0x4b   :  { %412 = vmatprep.subr.bf16.mxu0 %v557_v0  ;;  %432 = vmatpush3.bf16.msra.mxu1 %v431_v38 }
  0x4c   :  { %433 = vmatprep.subr.bf16.mxu1 %v557_v0 }
  0x4e   :  { %414 = vmatpush3.bf16.msra.mxu0 %v413_v19 }
  0x4f   :  { %415 = vmatprep.subr.bf16.mxu0 %v557_v0  ;;  %435 = vmatpush3.bf16.msra.mxu1 %v434_v41 }
  0x50   :  { %436 = vmatprep.subr.bf16.mxu1 %v557_v0 }
  0x52   :  { %417 = vmatpush3.bf16.msra.mxu0 %v416_v22 }
  0x53   :  { %418 = vmatprep.subr.bf16.mxu0 %v557_v0  ;;  %438 = vmatpush3.bf16.msra.mxu1 %v437_v44 }
  0x54   :  { %439 = vmatprep.subr.bf16.mxu1 %v557_v0 }
  0x56   :  { %420 = vmatpush3.bf16.msra.mxu0 %v419_v25 }
  0x57   :  { %441 = vmatpush3.bf16.msra.mxu1 %v440_v47 }
  0x58   :  { %442 = vmatprep.subr.bf16.mxu1 %v557_v0 }
  0x59   :  { %360 = vmatmul.mubr.f32.vlgmr.msra.gmra.mrb[0].mxu0 %v57_v26 }
  0x5b   :  { %444 = vmatpush3.bf16.msra.mxu1 %v443_v50 }
 0x12c   :  { %v140_v51 = vpop.f32.mrb[0].mxu0 }
 0x12d   :  { %v144_v52 = vrot.slane %v140_v51, 4  ;;  %v361_v53 = vpop.f32.mrb[1].mxu0 }
 0x12f   :  { %v145_v54 = vadd.f32 %v144_v52, %v140_v51 }
 0x131   :  { %v146_v55 = vrot.slane %v145_v54, 2 }
 0x133   :  { %v147_v56 = vadd.f32 %v146_v55, %v145_v54 }
 0x135   :  { %v148_v57 = vrot.slane %v147_v56, 1 }
 0x137   :  { %v149_v58 = vadd.f32 %v148_v57, %v147_v56 }
 0x139   :  { %v151_v59 = vmul.f32 0.125, %v149_v58 }
 0x13b   :  { %v152_v60 = vsub.f32 %v140_v51, %v151_v59 }
 0x13d   :  { %v153_v61 = vmul.f32 %v152_v60, %v152_v60 }
 0x13f   :  { %v154_v62 = vrot.slane %v153_v61, 4 }
 0x141   :  { %v155_v63 = vadd.f32 %v154_v62, %v153_v61 }
 0x143   :  { %v156_v1 = vrot.slane %v155_v63, 2 }
 0x145   :  { %v157_v2 = vadd.f32 %v156_v1, %v155_v63 }
 0x147   :  { %v158_v0 = vrot.slane %v157_v2, 1 }
 0x149   :  { %v159_v3 = vadd.f32 %v158_v0, %v157_v2 }
 0x14b   :  { %v160_v4 = vmul.f32 0.125, %v159_v3 }
 0x14d   :  { %v163_v5 = vadd.f32 1e-05, %v160_v4 }
 0x14f   :  { %454 = vrsqrt.f32 %v163_v5 }
 0x159   :  { %v455_v10 = vpop.eup %454 }
 0x15a   :  { %v165_v11 = vmul.f32 %v455_v10, %v161_v8 }
 0x15c   :  { %v169_v12 = vrot.slane %v165_v11, %v168_v9 }
 0x15e   :  { %v170_v14 = vmul.f32 %v169_v12, %v152_v60 }
 0x160   :  { %v175_v15 = vadd.f32 %v291_v13, %v170_v14 }
 0x162   :  { %v176_v16 = vmax.f32 %v175_v15, 0.0 }
 0x164   :  { %395 = vmatmul.mubr.f32.vlgmr.msra.gmra.mrb[0].mxu1 %v176_v16 }
 0x237   :  { %v264_v18 = vpop.f32.mrb[0].mxu1 }
 0x238   :  { %v265_v19 = vadd.f32 %v292_v17, %v264_v18  ;;  %v396_v20 = vpop.f32.mrb[1].mxu1 }
 0x23a   :  { %v268_v21 = vmul.f32 %v265_v19, %v265_v19 }
 0x23c   :  { %269 = vadd.xlane.f32.xlu0 %v268_v21 }
 0x2c9   :  { %v270_v22 = vpop.xlane.xlu0 %269 }
 0x2ca   :  { %v271_v23 = vmax.f32 %v270_v22, 1e-24 }
 0x2cc   :  { %456 = vrsqrt.f32 %v271_v23 }
 0x2d6   :  { %v457_v24 = vpop.eup %456 }
 0x2d7   :  { %v273_v25 = vmul.f32 %v457_v24, %v265_v19 }
 0x2d9   :  { %274 = vst [vmem:[#allocation8] sm:$0xff] %v273_v25 }
 0x2da   :  { %535 = shalt.err (!%p532_p0)
}
 0x2db   :  { %s536_s8 = scalar_lea.hbm %s669_s4, 128 }
 0x2dc   :  { %p537_p1 = scmp.ne.s32.totalorder %s669_s4, %s536_s8  ;;  %p540_p2 = scmp.lt.u32.totalorder %s536_s8, %s669_s4 }
 0x2de   :  { %p542_p3 = pnand %p540_p2, %p537_p1 }
 0x2e0   :  { %545 = shalt.err (!%p542_p3)
}
 0x2e1   :  { %284 = dma.vmem_to_hbm [thread:$0]  %s282_s5, 128, %s669_s4, [#allocation4]  }
 0x2e2   :  { %550 = dma.done.wait [#allocation4], 128  }
 0x2e3   :  { %551 = vsyncadd [#allocation4], 4294967168 }
 0x2e4   :  { %288 = vsyncpa [#allocation3], 1 }
 0x2e5   :  { %289 = vsyncpa [#allocation6], 1 }
 0x2e6   :  { %290 = vsyncpa [#allocation4], 1 }

</bundles_post_ra>
